<compile_context>
chip_gen: v5e
topology: v5e:2x2
jax: 0.10.0
libtpu: 0.0.40
codegen_flags: <defaults>
</compile_context>

<pallas_src>
import functools

import jax
import jax.numpy as jnp
from jax.experimental import pallas as pl
from jax.experimental.pallas import tpu as pltpu


# ----------------------------------------------------------------------------
# Pallas kernel: one (batch, L-tile) step of the fused gated temporal block.
# ----------------------------------------------------------------------------
def _gated_block_kernel(x_ref, w1_ref, b1_ref, w2_ref, b2_ref, out_ref,
                        xbuf, ubuf, *, k, dil, pad, n_out):
    """
    x_ref  : (1, c2, Lt)      input tile (storage dtype)
    w1_ref : (c2, k*c2)       conv1 weight, [o, j*c2 + c] = W1_torch[o, c, j]
    b1_ref : (c2, 1)          f32
    w2_ref : (c2, k*c2)
    b2_ref : (c2, 1)
    out_ref: (1, c2, Lt)
    xbuf   : (c2, pad+Lt)     VMEM scratch; cols [0,pad) = causal halo carry
    ubuf   : (c2, pad+Lt)     VMEM scratch for the gated conv1 output
    """
    i = pl.program_id(1)                 # L-tile index (sequential / "arbitrary")
    Lt = out_ref.shape[2]

    x_tile = x_ref[0]                    # (c2, Lt)

    if pad > 0:
        @pl.when(i == 0)
        def _zero_halo():
            xbuf[:, 0:pad] = jnp.zeros((xbuf.shape[0], pad), xbuf.dtype)
            ubuf[:, 0:pad] = jnp.zeros((ubuf.shape[0], pad), ubuf.dtype)

        @pl.when(i > 0)
        def _carry_halo():
            # last `pad` time steps of the previous tile become the new halo
            xh = xbuf[:, Lt:Lt + pad]
            uh = ubuf[:, Lt:Lt + pad]
            xbuf[:, 0:pad] = xh
            ubuf[:, 0:pad] = uh

    xbuf[:, pad:pad + Lt] = x_tile

    # ---- conv1: single (c2, k*c2) @ (k*c2, Lt) matmul over an im2col slab ----
    slab1 = jnp.concatenate(
        [xbuf[:, j * dil:j * dil + Lt] for j in range(k)], axis=0)
    y1 = jnp.dot(w1_ref[...], slab1,
                 preferred_element_type=jnp.float32) + b1_ref[...]
    g1 = jax.nn.sigmoid(y1[n_out:, :])
    h1 = y1[0:n_out, :] * g1
    # write gated halves directly (no concatenate)
    ubuf[0:n_out, pad:pad + Lt] = h1.astype(ubuf.dtype)
    ubuf[n_out:, pad:pad + Lt] = g1.astype(ubuf.dtype)

    # ---- conv2 ---------------------------------------------------------------
    slab2 = jnp.concatenate(
        [ubuf[:, j * dil:j * dil + Lt] for j in range(k)], axis=0)
    y2 = jnp.dot(w2_ref[...], slab2,
                 preferred_element_type=jnp.float32) + b2_ref[...]
    g2 = jax.nn.sigmoid(y2[n_out:, :])
    h2 = y2[0:n_out, :] * g2

    # ---- residual: hidden + x  (n_inputs == n_outputs => downsample is None) --
    x_f32 = x_tile.astype(jnp.float32)
    out_ref[0, 0:n_out, :] = (h2 + x_f32[0:n_out, :]).astype(out_ref.dtype)
    out_ref[0, n_out:, :] = (g2 + x_f32[n_out:, :]).astype(out_ref.dtype)


# ----------------------------------------------------------------------------
# Wrapper
# ----------------------------------------------------------------------------
def _choose_l_tile(L, max_tile=2048):
    """Lane-dense time tile: a multiple of 128, or the whole sequence."""
    if L <= max_tile:
        return L
    t = (max_tile // 128) * 128
    while t >= 128:
        if L % t == 0:
            return t
        t -= 128
    return (max_tile // 128) * 128   # last block partial; Pallas masks edge blocks


def gated_temporal_block_sig(x_ncw, params, *, kernel_size, dilation, padding,
                             stride=1, storage_dtype=jnp.float32, l_tile=None):
    """x_ncw: (N, 2*n_inputs, L) float32 (PyTorch NCW).  Returns (N, 2*n_outputs, L).

    params = (w1, b1, w2, b2) in PyTorch Conv1d layout (effective, weight-norm
    already applied): w1:(2*n_out, 2*n_in, k), b1:(2*n_out,), w2:(2*n_out, 2*n_out, k).
    """
    w1, b1, w2, b2 = params
    N, c_in2, L = x_ncw.shape
    c2 = w1.shape[0]
    k = kernel_size
    n_out = c2 // 2
    assert stride == 1, "only stride=1 supported (TCN block)"
    assert w1.shape == (c2, c_in2, k) and w2.shape == (c2, c2, k)
    assert padding == dilation * (kernel_size - 1), \
        "residual add requires padding == dilation*(kernel_size-1)"
    assert c_in2 == c2, "n_inputs must equal n_outputs (see downsample TODO)"

    Lt = l_tile if l_tile is not None else _choose_l_tile(L)
    assert Lt == L or Lt % 128 == 0, "l_tile must be a multiple of 128 or == L"
    n_lt = pl.cdiv(L, Lt)
    pad = padding
    sdt = storage_dtype

    x_s = x_ncw.astype(sdt)
    # (o, c, j) -> (o, j, c) -> (o, j*c)  so tap-j rows line up with the im2col slab
    w1_2d = jnp.transpose(w1, (0, 2, 1)).reshape(c2, k * c_in2).astype(sdt)
    w2_2d = jnp.transpose(w2, (0, 2, 1)).reshape(c2, k * c2).astype(sdt)
    b1_c = b1.reshape(c2, 1).astype(jnp.float32)
    b2_c = b2.reshape(c2, 1).astype(jnp.float32)

    kern = functools.partial(_gated_block_kernel, k=k, dil=dilation, pad=pad,
                             n_out=n_out)

    out = pl.pallas_call(
        kern,
        out_shape=jax.ShapeDtypeStruct((N, c2, L), x_ncw.dtype),
        grid_spec=pltpu.PrefetchScalarGridSpec(
            num_scalar_prefetch=0,
            grid=(N, n_lt),
            in_specs=[
                pl.BlockSpec((1, c_in2, Lt), lambda b, i: (b, 0, i)),
                pl.BlockSpec((c2, k * c_in2), lambda b, i: (0, 0)),
                pl.BlockSpec((c2, 1), lambda b, i: (0, 0)),
                pl.BlockSpec((c2, k * c2), lambda b, i: (0, 0)),
                pl.BlockSpec((c2, 1), lambda b, i: (0, 0)),
            ],
            out_specs=pl.BlockSpec((1, c2, Lt), lambda b, i: (b, 0, i)),
            scratch_shapes=[
                pltpu.VMEM((c_in2, pad + Lt), sdt),   # x ring buffer w/ causal halo
                pltpu.VMEM((c2, pad + Lt), sdt),      # gated conv1 output + halo
            ],
        ),
        compiler_params=pltpu.CompilerParams(
            dimension_semantics=("parallel", "arbitrary")),
    )(x_s, w1_2d, b1_c, w2_2d, b2_c)
    return out


# ----------------------------------------------------------------------------
# Parameter construction (reproduces weight_norm semantics deterministically).
# ----------------------------------------------------------------------------
def _weight_norm_effective(v, g):
    # PyTorch weight_norm(dim=0) for Conv1d: w = g * v / ||v|| over dims (1, 2).
    norm = jnp.sqrt(jnp.sum(v * v, axis=(1, 2), keepdims=True))
    return g * v / norm


def make_params(key, n_inputs, n_outputs, kernel_size):
    c_in2, c2 = 2 * n_inputs, 2 * n_outputs
    ks = jax.random.split(key, 4)
    # init_weights' .normal_(0, 0.01) on the derived .weight is a no-op on the
    # weight-norm forward; at wrap time g = ||v||, so effective weight == v.
    v1 = 0.01 * jax.random.normal(ks[0], (c2, c_in2, kernel_size), jnp.float32)
    v2 = 0.01 * jax.random.normal(ks[1], (c2, c2, kernel_size), jnp.float32)
    g1 = jnp.sqrt(jnp.sum(v1 * v1, axis=(1, 2), keepdims=True))
    g2 = jnp.sqrt(jnp.sum(v2 * v2, axis=(1, 2), keepdims=True))
    w1 = _weight_norm_effective(v1, g1)
    w2 = _weight_norm_effective(v2, g2)
    b1 = 0.05 * jax.random.normal(ks[2], (c2,), jnp.float32)
    b2 = 0.05 * jax.random.normal(ks[3], (c2,), jnp.float32)
    return (w1, b1, w2, b2)


# ----------------------------------------------------------------------------
# Pure-JAX reference of GatedTemporalBlock_sig.forward (eval mode).
# ----------------------------------------------------------------------------
def reference_forward(x, params, *, kernel_size, dilation, padding):
    w1, b1, w2, b2 = params
    n_out = w1.shape[0] // 2

    def conv(h, w, b):
        y = jax.lax.conv_general_dilated(
            h, w, window_strides=(1,), padding=[(padding, padding)],
            rhs_dilation=(dilation,), dimension_numbers=('NCH', 'OIH', 'NCH'))
        return y + b[None, :, None]

    y1 = conv(x, w1, b1)
    g = jax.nn.sigmoid(y1[:, n_out:])
    u = jnp.concatenate([y1[:, :n_out] * g, g], axis=1)[:, :, :-padding]   # chomp1
    y2 = conv(u, w2, b2)
    g = jax.nn.sigmoid(y2[:, n_out:])
    hid = jnp.concatenate([y2[:, :n_out] * g, g], axis=1)[:, :, :-padding]  # chomp2
    return hid + x                                   # downsample is None here


# ----------------------------------------------------------------------------
if __name__ == "__main__":
    # GatedTemporalBlock_sig(n_inputs=4, n_outputs=4, kernel_size=3, stride=1,
    #                        dilation=1, padding=2)  -> input (N, 2*n_inputs, L)
    N, n_in, n_out_ch, L = 2, 4, 4, 16
    K, DIL = 3, 1
    PAD = DIL * (K - 1)

    key = jax.random.PRNGKey(0)
    kx, kp, kx2 = jax.random.split(key, 3)
    x = jax.random.normal(kx, (N, 2 * n_in, L), jnp.float32)
    params = make_params(kp, n_in, n_out_ch, K)

    out = gated_temporal_block_sig(x, params, kernel_size=K, dilation=DIL,
                                   padding=PAD)
    out = jax.block_until_ready(out)
    ref = reference_forward(x, params, kernel_size=K, dilation=DIL, padding=PAD)
    assert out.shape == (N, 2 * n_out_ch, L), out.shape
    assert jnp.allclose(out, ref, rtol=1e-4, atol=1e-4), \
        f"max err {jnp.max(jnp.abs(out - ref))}"

    # multi-L-tile path: exercises the causal halo carry across grid steps.
    L2 = 256
    x2 = jax.random.normal(kx2, (N, 2 * n_in, L2), jnp.float32)
    out2 = gated_temporal_block_sig(x2, params, kernel_size=K, dilation=DIL,
                                    padding=PAD, l_tile=128)
    out2 = jax.block_until_ready(out2)
    ref2 = reference_forward(x2, params, kernel_size=K, dilation=DIL, padding=PAD)
    assert jnp.allclose(out2, ref2, rtol=1e-4, atol=1e-4), \
        f"tiled max err {jnp.max(jnp.abs(out2 - ref2))}"

    # bf16 storage path (v6e/v7x HBM-traffic win); dots accumulate in f32.
    out_bf = gated_temporal_block_sig(x2, params, kernel_size=K, dilation=DIL,
                                      padding=PAD, l_tile=128,
                                      storage_dtype=jnp.bfloat16)
    out_bf = jax.block_until_ready(out_bf)
    assert jnp.allclose(out_bf, ref2, rtol=5e-2, atol=5e-2), \
        f"bf16 max err {jnp.max(jnp.abs(out_bf - ref2))}"

    print("KERNEL_OK")
</pallas_src>

<mosaic_0001>
module attributes {stable_mosaic.version = 11 : i64} {
  func.func @_gated_block_kernel(%arg0: i32, %arg1: i32, %arg2: memref<1x8x16xf32, #tpu.memory_space<vmem>>, %arg3: memref<8x24xf32, #tpu.memory_space<vmem>>, %arg4: memref<8x1xf32, #tpu.memory_space<vmem>>, %arg5: memref<8x24xf32, #tpu.memory_space<vmem>>, %arg6: memref<8x1xf32, #tpu.memory_space<vmem>>, %arg7: memref<1x8x16xf32, #tpu.memory_space<vmem>>, %arg8: memref<8x18xf32, #tpu.memory_space<vmem>>, %arg9: memref<8x18xf32, #tpu.memory_space<vmem>>) attributes {dimension_semantics = [#tpu.dimension_semantics<parallel>, #tpu.dimension_semantics<arbitrary>], iteration_bounds = array<i64: 2, 1>, scalar_prefetch = 0 : i64, scratch_operands = 2 : i64, tpu.core_type = #tpu.core_type<tc>, window_params = [{transform_indices = @transform_0, window_bounds = array<i64: 1, 8, 16>}, {pipeline_mode = #tpu.pipeline_mode<synchronous>, transform_indices = @transform_1, window_bounds = array<i64: 8, 24>}, {pipeline_mode = #tpu.pipeline_mode<synchronous>, transform_indices = @transform_2, window_bounds = array<i64: 8, 1>}, {pipeline_mode = #tpu.pipeline_mode<synchronous>, transform_indices = @transform_3, window_bounds = array<i64: 8, 24>}, {pipeline_mode = #tpu.pipeline_mode<synchronous>, transform_indices = @transform_4, window_bounds = array<i64: 8, 1>}, {transform_indices = @transform_5, window_bounds = array<i64: 1, 8, 16>}]} {
    %c0 = arith.constant 0 : index
    %c0_0 = arith.constant 0 : index
    %c0_1 = arith.constant 0 : index
    %0 = vector.load %arg2[%c0, %c0_0, %c0_1] : memref<1x8x16xf32, #tpu.memory_space<vmem>>, vector<1x8x16xf32>
    %1 = vector.shape_cast %0 : vector<1x8x16xf32> to vector<8x16xf32>
    %c0_i32 = arith.constant 0 : i32
    %2 = arith.cmpi eq, %arg1, %c0_i32 : i32
    %3 = arith.extui %2 : i1 to i32
    %c0_i32_2 = arith.constant 0 : i32
    %4 = arith.cmpi ne, %3, %c0_i32_2 : i32
    scf.if %4 {
      %cst_37 = arith.constant 0.000000e+00 : f32
      %55 = vector.broadcast %cst_37 : f32 to vector<8x2xf32>
      %c0_38 = arith.constant 0 : index
      %c0_39 = arith.constant 0 : index
      %56 = vector.load %arg8[%c0_38, %c0_39] : memref<8x18xf32, #tpu.memory_space<vmem>>, vector<8x2xf32>
      tpu.vector_store %arg8[%c0_38, %c0_39], %55 {strides = array<i32>} : memref<8x18xf32, #tpu.memory_space<vmem>>, vector<8x2xf32>,
      %cst_40 = arith.constant 0.000000e+00 : f32
      %57 = vector.broadcast %cst_40 : f32 to vector<8x2xf32>
      %c0_41 = arith.constant 0 : index
      %c0_42 = arith.constant 0 : index
      %58 = vector.load %arg9[%c0_41, %c0_42] : memref<8x18xf32, #tpu.memory_space<vmem>>, vector<8x2xf32>
      tpu.vector_store %arg9[%c0_41, %c0_42], %57 {strides = array<i32>} : memref<8x18xf32, #tpu.memory_space<vmem>>, vector<8x2xf32>,
    } else {
    }
    %c0_i32_3 = arith.constant 0 : i32
    %5 = arith.cmpi sgt, %arg1, %c0_i32_3 : i32
    %6 = arith.extui %5 : i1 to i32
    %c0_i32_4 = arith.constant 0 : i32
    %7 = arith.cmpi ne, %6, %c0_i32_4 : i32
    scf.if %7 {
      %c0_37 = arith.constant 0 : index
      %c16 = arith.constant 16 : index
      %55 = vector.load %arg8[%c0_37, %c16] : memref<8x18xf32, #tpu.memory_space<vmem>>, vector<8x2xf32>
      %c0_38 = arith.constant 0 : index
      %c16_39 = arith.constant 16 : index
      %56 = vector.load %arg9[%c0_38, %c16_39] : memref<8x18xf32, #tpu.memory_space<vmem>>, vector<8x2xf32>
      %c0_40 = arith.constant 0 : index
      %c0_41 = arith.constant 0 : index
      %57 = vector.load %arg8[%c0_40, %c0_41] : memref<8x18xf32, #tpu.memory_space<vmem>>, vector<8x2xf32>
      tpu.vector_store %arg8[%c0_40, %c0_41], %55 {strides = array<i32>} : memref<8x18xf32, #tpu.memory_space<vmem>>, vector<8x2xf32>,
      %c0_42 = arith.constant 0 : index
      %c0_43 = arith.constant 0 : index
      %58 = vector.load %arg9[%c0_42, %c0_43] : memref<8x18xf32, #tpu.memory_space<vmem>>, vector<8x2xf32>
      tpu.vector_store %arg9[%c0_42, %c0_43], %56 {strides = array<i32>} : memref<8x18xf32, #tpu.memory_space<vmem>>, vector<8x2xf32>,
    } else {
    }
    %c0_5 = arith.constant 0 : index
    %c2 = arith.constant 2 : index
    %8 = vector.load %arg8[%c0_5, %c2] : memref<8x18xf32, #tpu.memory_space<vmem>>, vector<8x16xf32>
    tpu.vector_store %arg8[%c0_5, %c2], %1 {strides = array<i32>} : memref<8x18xf32, #tpu.memory_space<vmem>>, vector<8x16xf32>,
    %c0_6 = arith.constant 0 : index
    %c0_7 = arith.constant 0 : index
    %9 = vector.load %arg8[%c0_6, %c0_7] : memref<8x18xf32, #tpu.memory_space<vmem>>, vector<8x16xf32>
    %c0_8 = arith.constant 0 : index
    %c1 = arith.constant 1 : index
    %10 = vector.load %arg8[%c0_8, %c1] : memref<8x18xf32, #tpu.memory_space<vmem>>, vector<8x16xf32>
    %c0_9 = arith.constant 0 : index
    %c2_10 = arith.constant 2 : index
    %11 = vector.load %arg8[%c0_9, %c2_10] : memref<8x18xf32, #tpu.memory_space<vmem>>, vector<8x16xf32>
    %12 = tpu.concatenate %9, %10, %11 in 0 : vector<8x16xf32>, vector<8x16xf32>, vector<8x16xf32> -> vector<24x16xf32>
    %c0_11 = arith.constant 0 : index
    %c0_12 = arith.constant 0 : index
    %13 = vector.load %arg3[%c0_11, %c0_12] : memref<8x24xf32, #tpu.memory_space<vmem>>, vector<8x24xf32>
    %cst = arith.constant dense<0.000000e+00> : vector<8x16xf32>
    %14 = tpu.matmul %13, %12, %cst {dimension_numbers = #tpu.dot_dimension_numbers<[1], [0], [0], [1], [0, 0, 1, 1], [], []>} : vector<8x24xf32>, vector<24x16xf32>, vector<8x16xf32> -> vector<8x16xf32>
    %c0_13 = arith.constant 0 : index
    %c0_14 = arith.constant 0 : index
    %15 = vector.load %arg4[%c0_13, %c0_14] : memref<8x1xf32, #tpu.memory_space<vmem>>, vector<8x1xf32>
    %16 = vector.broadcast %15 : vector<8x1xf32> to vector<8x16xf32>
    %17 = arith.addf %14, %16 : vector<8x16xf32>
    %18 = vector.extract_strided_slice %17 {offsets = [4, 0], sizes = [4, 16], strides = [1, 1]} : vector<8x16xf32> to vector<4x16xf32>
    %19 = arith.negf %18 : vector<4x16xf32>
    %20 = math.exp %19 : vector<4x16xf32>
    %cst_15 = arith.constant 1.000000e+00 : f32
    %21 = vector.broadcast %cst_15 : f32 to vector<4x16xf32>
    %22 = arith.addf %21, %20 : vector<4x16xf32>
    %23 = arith.divf %21, %22 : vector<4x16xf32>
    %24 = vector.extract_strided_slice %17 {offsets = [0, 0], sizes = [4, 16], strides = [1, 1]} : vector<8x16xf32> to vector<4x16xf32>
    %25 = arith.mulf %24, %23 : vector<4x16xf32>
    %c0_16 = arith.constant 0 : index
    %c2_17 = arith.constant 2 : index
    %26 = vector.load %arg9[%c0_16, %c2_17] : memref<8x18xf32, #tpu.memory_space<vmem>>, vector<4x16xf32>
    tpu.vector_store %arg9[%c0_16, %c2_17], %25 {strides = array<i32>} : memref<8x18xf32, #tpu.memory_space<vmem>>, vector<4x16xf32>,
    %c4 = arith.constant 4 : index
    %c2_18 = arith.constant 2 : index
    %27 = vector.load %arg9[%c4, %c2_18] : memref<8x18xf32, #tpu.memory_space<vmem>>, vector<4x16xf32>
    tpu.vector_store %arg9[%c4, %c2_18], %23 {strides = array<i32>} : memref<8x18xf32, #tpu.memory_space<vmem>>, vector<4x16xf32>,
    %c0_19 = arith.constant 0 : index
    %c0_20 = arith.constant 0 : index
    %28 = vector.load %arg9[%c0_19, %c0_20] : memref<8x18xf32, #tpu.memory_space<vmem>>, vector<8x16xf32>
    %c0_21 = arith.constant 0 : index
    %c1_22 = arith.constant 1 : index
    %29 = vector.load %arg9[%c0_21, %c1_22] : memref<8x18xf32, #tpu.memory_space<vmem>>, vector<8x16xf32>
    %c0_23 = arith.constant 0 : index
    %c2_24 = arith.constant 2 : index
    %30 = vector.load %arg9[%c0_23, %c2_24] : memref<8x18xf32, #tpu.memory_space<vmem>>, vector<8x16xf32>
    %31 = tpu.concatenate %28, %29, %30 in 0 : vector<8x16xf32>, vector<8x16xf32>, vector<8x16xf32> -> vector<24x16xf32>
    %c0_25 = arith.constant 0 : index
    %c0_26 = arith.constant 0 : index
    %32 = vector.load %arg5[%c0_25, %c0_26] : memref<8x24xf32, #tpu.memory_space<vmem>>, vector<8x24xf32>
    %cst_27 = arith.constant dense<0.000000e+00> : vector<8x16xf32>
    %33 = tpu.matmul %32, %31, %cst_27 {dimension_numbers = #tpu.dot_dimension_numbers<[1], [0], [0], [1], [0, 0, 1, 1], [], []>} : vector<8x24xf32>, vector<24x16xf32>, vector<8x16xf32> -> vector<8x16xf32>
    %c0_28 = arith.constant 0 : index
    %c0_29 = arith.constant 0 : index
    %34 = vector.load %arg6[%c0_28, %c0_29] : memref<8x1xf32, #tpu.memory_space<vmem>>, vector<8x1xf32>
    %35 = vector.broadcast %34 : vector<8x1xf32> to vector<8x16xf32>
    %36 = arith.addf %33, %35 : vector<8x16xf32>
    %37 = vector.extract_strided_slice %36 {offsets = [4, 0], sizes = [4, 16], strides = [1, 1]} : vector<8x16xf32> to vector<4x16xf32>
    %38 = arith.negf %37 : vector<4x16xf32>
    %39 = math.exp %38 : vector<4x16xf32>
    %cst_30 = arith.constant 1.000000e+00 : f32
    %40 = vector.broadcast %cst_30 : f32 to vector<4x16xf32>
    %41 = arith.addf %40, %39 : vector<4x16xf32>
    %42 = arith.divf %40, %41 : vector<4x16xf32>
    %43 = vector.extract_strided_slice %36 {offsets = [0, 0], sizes = [4, 16], strides = [1, 1]} : vector<8x16xf32> to vector<4x16xf32>
    %44 = arith.mulf %43, %42 : vector<4x16xf32>
    %45 = vector.extract_strided_slice %1 {offsets = [0, 0], sizes = [4, 16], strides = [1, 1]} : vector<8x16xf32> to vector<4x16xf32>
    %46 = arith.addf %44, %45 : vector<4x16xf32>
    %c0_31 = arith.constant 0 : index
    %c0_32 = arith.constant 0 : index
    %c0_33 = arith.constant 0 : index
    %47 = vector.load %arg7[%c0_31, %c0_32, %c0_33] : memref<1x8x16xf32, #tpu.memory_space<vmem>>, vector<1x4x16xf32>
    %48 = vector.shape_cast %47 : vector<1x4x16xf32> to vector<4x16xf32>
    %49 = vector.shape_cast %46 : vector<4x16xf32> to vector<1x4x16xf32>
    tpu.vector_store %arg7[%c0_31, %c0_32, %c0_33], %49 {strides = array<i32>} : memref<1x8x16xf32, #tpu.memory_space<vmem>>, vector<1x4x16xf32>,
    %50 = vector.extract_strided_slice %1 {offsets = [4, 0], sizes = [4, 16], strides = [1, 1]} : vector<8x16xf32> to vector<4x16xf32>
    %51 = arith.addf %42, %50 : vector<4x16xf32>
    %c0_34 = arith.constant 0 : index
    %c4_35 = arith.constant 4 : index
    %c0_36 = arith.constant 0 : index
    %52 = vector.load %arg7[%c0_34, %c4_35, %c0_36] : memref<1x8x16xf32, #tpu.memory_space<vmem>>, vector<1x4x16xf32>
    %53 = vector.shape_cast %52 : vector<1x4x16xf32> to vector<4x16xf32>
    %54 = vector.shape_cast %51 : vector<4x16xf32> to vector<1x4x16xf32>
    tpu.vector_store %arg7[%c0_34, %c4_35, %c0_36], %54 {strides = array<i32>} : memref<1x8x16xf32, #tpu.memory_space<vmem>>, vector<1x4x16xf32>,
    return
  }
  func.func @transform_0(%arg0: i32, %arg1: i32) -> (i32, i32, i32) {
    %c0_i32 = arith.constant 0 : i32
    %c0_i32_0 = arith.constant 0 : i32
    return %arg0, %c0_i32, %arg1 : i32, i32, i32
  }
  func.func @transform_1(%arg0: i32, %arg1: i32) -> (i32, i32) {
    %c0_i32 = arith.constant 0 : i32
    %c0_i32_0 = arith.constant 0 : i32
    %c0_i32_1 = arith.constant 0 : i32
    return %c0_i32, %c0_i32_0 : i32, i32
  }
  func.func @transform_2(%arg0: i32, %arg1: i32) -> (i32, i32) {
    %c0_i32 = arith.constant 0 : i32
    %c0_i32_0 = arith.constant 0 : i32
    %c0_i32_1 = arith.constant 0 : i32
    return %c0_i32, %c0_i32_0 : i32, i32
  }
  func.func @transform_3(%arg0: i32, %arg1: i32) -> (i32, i32) {
    %c0_i32 = arith.constant 0 : i32
    %c0_i32_0 = arith.constant 0 : i32
    %c0_i32_1 = arith.constant 0 : i32
    return %c0_i32, %c0_i32_0 : i32, i32
  }
  func.func @transform_4(%arg0: i32, %arg1: i32) -> (i32, i32) {
    %c0_i32 = arith.constant 0 : i32
    %c0_i32_0 = arith.constant 0 : i32
    %c0_i32_1 = arith.constant 0 : i32
    return %c0_i32, %c0_i32_0 : i32, i32
  }
  func.func @transform_5(%arg0: i32, %arg1: i32) -> (i32, i32, i32) {
    %c0_i32 = arith.constant 0 : i32
    %c0_i32_0 = arith.constant 0 : i32
    return %arg0, %c0_i32, %arg1 : i32, i32, i32
  }
}

</mosaic_0001>

<bundles_post_ra>
// kernel: tpu_custom_call.1
= control target key start
LH: loop header
LB: loop body
LE: loop exit
PB: predicated region body
PF: predicated region fallthrough
CT: control target
= control target key end

     0   :  { %10 = vsyncpa [#allocation5], 0  ;;  %s997_s0 = inlined_call_operand.vmem [shape: f32[2,8,16], index: 0, kind: input, shape index: {}]   ;;  %s998_s1 = inlined_call_operand.hbm [shape: f32[8,24], index: 1, kind: input, shape index: {}]   ;;  %s999_s2 = inlined_call_operand.vmem [shape: f32[8,1], index: 2, kind: input, shape index: {}]   ;;  %s1000_s3 = inlined_call_operand.hbm [shape: f32[8,24], index: 3, kind: input, shape index: {}]   ;;  %s1001_s4 = inlined_call_operand.vmem [shape: f32[8,1], index: 4, kind: input, shape index: {}]   ;;  %s1002_s5 = inlined_call_operand.hbm [shape: f32[2,8,16], index: 5, kind: output, shape index: {}]  }
   0x1   :  { %11 = vsyncpa [#allocation8], 0 }
   0x2   :  { %12 = vsyncpa [#allocation6], 0 }
   0x3   :  { %14 = vsyncpa [#allocation6 + $0x1], 0  ;;  %s852_s18 = smov 0   ;;  %s854_s19 = smov 0  }
   0x4   :  { %s856_s20 = smov 0   ;;  %s858_s21 = smov 0  }
   0x5   :  { %s860_s22 = smov 0   ;;  %s862_s23 = smov 0  }
   0x6 LB: > { %s556_s24 = sadd.s32 4294967295, %s813_s23   ;;  %s557_s25 = sadd.s32 4294967294, %s813_s23   ;;  %s813_s23 = sphi %s862_s23, %s20_s23   ;;  %s809_s22 = sphi %s860_s22, %s1011_s22   ;;  %s805_s21 = sphi %s858_s21, %s1010_s21   ;;  %s801_s20 = sphi %s856_s20, %s1009_s20   ;;  %s797_s19 = sphi %s854_s19, %s1008_s19   ;;  %s793_s18 = sphi %s852_s18, %s1007_s18  }
   0x7   : > { %s32_s26 = sadd.s32 1, %s809_s22  ;;  %s153_s27 = sadd.s32 1, %s801_s20 }
   0x8   : > { %p34_p0 = scmp.ge.s32.totalorder %s32_s26, 2  ;;  %p163_p1 = scmp.ne.s32.totalorder %s801_s20, %s797_s19 }
   0x9   : > { %p164_p2 = scmp.eq.s32.totalorder %s556_s24, 1  ;;  %p169_p3 = scmp.ne.s32.totalorder %s797_s19, %s793_s18 }
   0xa   : > { %s1013_s26 = smov (%p34_p0, %s32_s26), 0  ;;  %p170_p5 = scmp.eq.s32.totalorder %s557_s25, 1 }
   0xb   : > { %p892_p4 = por %p164_p2, %p163_p1  ;;  %s148_s29 = ssub.s32 %s809_s22, %s1013_s26 }
   0xc   : > { %p558_p6 = scmp.ge.s32.totalorder %s813_s23, 1  ;;  %p151_p7 = scmp.eq.s32.totalorder %s148_s29, 0 }
   0xd   : > { %p899_p8 = por %p170_p5, %p169_p3  ;;  %p177_p9 = scmp.lt.s32.totalorder %s813_s23, 3 }
   0xe   : > { %s905_s6 = scalar_select %p151_p7, %s801_s20, %s153_s27  }
   0xf   : > { %p907_p10 = pnand %p558_p6, %p177_p9  ;;  %p911_p11 = scmp.eq.s32.totalorder %s556_s24, 0 }
  0x10   : > { %s189_s11 = sshll.u32 %s998_s1, 4  ;;  %s815_s12 = smov [#allocation4]   ;;  %s190_s11 = int_to_ptr.hbm [resolvable:$true] %s189_s11 }
  0x11   : > { %p585_p12 = pneg %p907_p10  ;;  %s191_s13 = sshll.u32 %s815_s12, 4  ;;  %s192_s13 = int_to_ptr.vmem [resolvable:$true] %s191_s13 }
  0x12   : > { %s204_s16 = sshll.u32 %s1000_s3, 4  ;;  %s816_s17 = smov [#allocation7]   ;;  %s205_s16 = int_to_ptr.hbm [resolvable:$true] %s204_s16 }
  0x13   : > { %p586_p13 = pnand %p911_p11, %p585_p12  ;;  %s206_s24 = sshll.u32 %s816_s17, 4  ;;  %s207_s24 = int_to_ptr.vmem [resolvable:$true] %s206_s24 }
  0x14   : > { %232 = sbr.rel (%p907_p10) target bundleno = 830 (0x33e), region = 40 }
  0x15   : > { %588 = dma.hbm_to_vmem [thread:$0]  (!%p586_p13), %s190_s11, 128, %s192_s13, [#allocation5]  }
  0x16   : > { %591 = dma.hbm_to_vmem [thread:$0]  (!%p586_p13), %s205_s16, 128, %s207_s24, [#allocation8]  }
  0x19   : > { %780 = dma.done.wait (%p911_p11), [#allocation5], 128  }
  0x1a   : > { %782 = vsyncadd (%p911_p11), [#allocation5], 4294967168 }
  0x1b   : > { %784 = dma.done.wait (%p911_p11), [#allocation8], 128  }
  0x1c   : > { %786 = vsyncadd (%p911_p11), [#allocation8], 4294967168  ;;  %p268_p0 = scmp.lt.s32.totalorder %s805_s21, 1  ;;  %vm280_vm0 = vcmask 15360   ;;  %v817_v0 = vmov 0.0   ;;  %s818_s10 = smov 2  }
  0x1d   : > { %281 = vst.msk [vmem:[#allocation2] sm:$0xff] %vm280_vm0, %v817_v0  ;;  %vm304_vm1 = vcmask 146448   ;;  %s819_s8 = smov 127   ;;  %s820_s11 = smov 126   ;;  %v315_v4 = vld [vmem:[%s999_s2] sm:$0xff]  ;;  %v821_v5 = vmov 0  }
  0x1e   : > { %s269_s25 = scalar_select %p268_p0, %s805_s21, 1  ;;  %282 = vst.msk [vmem:[#allocation3] sm:$0xff] %vm280_vm0, %v817_v0  ;;  %656 = vset.pattern.permute.xlu1 %v821_v5  ;;  %657 = vset.pattern.permute.xlu2 %v821_v5  ;;  %v314_v8 = vld [vmem:[#allocation4] sm:$0xff]  ;;  %vm321_vm2 = vcmask 195584   ;;  %vm372_vm7 = vcmask 142352   ;;  %vm377_vm8 = vcmask 146452  }
  0x1f   : > { %658 = vset.pattern.permute.xlu0 %v821_v5  ;;  %v388_v30 = vld [vmem:[%s1001_s4] sm:$0xff]  ;;  %v387_v33 = vld [vmem:[#allocation7] sm:$0xff]  ;;  %s265_s16 = sand.u32 1, %s797_s19   ;;  %s572_s17 = sshll.u32 %s805_s21, 3  ;;  %vm444_vm13 = vcmask 130052   ;;  %vm441_vm14 = vcmask 125952  }
  0x20   : > { %s566_s27 = sshll.u32 %s269_s25, 3  ;;  %s565_s24 = sshll.u32 %s265_s16, 3 }
  0x21   : > { %s274_s9 = scalar_lea.vmem %s997_s0, %s566_s27  ;;  %s458_s29 = scalar_lea.hbm %s1002_s5, %s572_s17 }
  0x22   : > { %v940_v1 = vld [vmem:[%s274_s9] sm:$0xff]  ;;  %s267_s7 = scalar_lea.vmem [#allocation9], %s565_s24  ;;  %s462_s21 = sshll.u32 %s458_s29, 4  ;;  %s463_s21 = int_to_ptr.hbm [resolvable:$true] %s462_s21 }
  0x23   : > { %301 = vrot.lane.b32.xlu0 %v940_v1, %s818_s10  ;;  %s460_s9 = sshll.u32 %s267_s7, 4  ;;  %s747_s14 = scalar_lea.hbm %s1002_s5, 16  ;;  %s461_s9 = int_to_ptr.vmem [resolvable:$true] %s460_s9 }
  0x95   : > { %v302_v2 = vpop.permute.xlu0 %301 }
  0x96   : > { %305 = vst.msk [vmem:[#allocation2] sm:$0xff] %vm304_vm1, %v302_v2 }
  0x9d   : > { %v306_v3 = vld [vmem:[#allocation2] sm:$0xff] }
  0x9e   : > { %308 = vrot.lane.b32.xlu1 %v306_v3, %s819_s8  ;;  %311 = vrot.lane.b32.xlu0 %v306_v3, %s820_s11 }
  0xa6   : > { %318 = vperm.xlu1 %656, %v315_v4  }
 0x110   : > { %v312_v6 = vpop.permute.xlu0 %311  ;;  %v309_v7 = vpop.permute.xlu1 %308 }
 0x111   : > { %338 = vmatpush.msra.mxu0 %v312_v6 }
 0x113   : > { %339 = vmatpush.msra.mxu0 %v309_v7 }
 0x115   : > { %340 = vmatpush.msra.mxu0 %v306_v3 }
 0x116   : > { %567 = vmatmul.msk.f32.vlgmr.msra.gmra.mxu0 %vm321_vm2, %v314_v8 }
 0x118   : > { %v319_v9 = vpop.permute.xlu1 %318 }
 0x193   : > { %v342_v10 = vpop.f32.mrf.mxu0 }
 0x194   : > { %v343_v11 = vadd.f32 %v342_v10, %v319_v9 }
 0x196   : > { %v568_v12 = vmul.f32 -1.442695, %v343_v11 }
 0x198   : > { %659 = vpow2.f32 %v568_v12 }
 0x19e   : > { %v660_v13 = vpop.eup %659 }
 0x19f   : > { %v348_v14 = vadd.f32 1.0, %v660_v13 }
 0x1a1   : > { %661 = vrcp.f32 %v348_v14  ;;  %v360_v18 = vand.u32 2147483648, %v348_v14  ;;  %v358_v20 = vand.u32 2147483647, %v348_v14  ;;  %vm354_vm4 = vweird.f32 %v348_v14 }
 0x1a3   : > { %v361_v22 = vor.u32 1.1754944e-38, %v360_v18  ;;  %vm359_vm6 = vcmp.eq.f32.partialorder %v358_v20, 8.507059e+37 }
 0x1a7   : > { %v662_v15 = vpop.eup %661 }
 0x1a8   : > { %v350_v16 = vmul.f32 %v662_v15, %v348_v14  ;;  %vm355_vm3 = vweird.f32 %v662_v15 }
 0x1a9   : > { %vm356_vm5 = vmor %vm354_vm4, %vm355_vm3 }
 0x1aa   : > { %v351_v17 = vsub.f32 1.0, %v350_v16 }
 0x1ac   : > { %v352_v19 = vmul.f32 %v662_v15, %v351_v17 }
 0x1ae   : > { %v353_v21 = vadd.f32 %v662_v15, %v352_v19 }
 0x1b0   : > { %v357_v23 = vsel %vm356_vm5, %v662_v15, %v353_v21 }
 0x1b1   : > { %v362_v24 = vsel %vm359_vm6, %v361_v22, %v357_v23 }
 0x1b2   : > { %v365_v25 = vrot.slane %v362_v24, 4 }
 0x1b4   : > { %v367_v26 = vmul.f32 %v365_v25, %v343_v11 }
 0x1b6   : > { %369 = vrot.lane.b32.xlu2 %v367_v26, %s818_s10 }
 0x1be   : > { %374 = vrot.lane.b32.xlu2 %v362_v24, %s818_s10  ;;  %s447_s10 = scalar_lea.sflag [#allocation6], %s265_s16 }
 0x1c6   : > { %391 = vperm.xlu2 %657, %v388_v30  }
 0x210   : > { %v370_v27 = vpop.permute.xlu2 %369 }
 0x211   : > { %373 = vst.msk [vmem:[#allocation3] sm:$0xf] %vm372_vm7, %v370_v27 }
 0x218   : > { %v375_v28 = vpop.permute.xlu2 %374 }
 0x219   : > { %378 = vst.msk [vmem:[#allocation3] sm:$0xf0] %vm377_vm8, %v375_v28 }
 0x220   : > { %v379_v29 = vld [vmem:[#allocation3] sm:$0xff]  ;;  %v392_v34 = vpop.permute.xlu2 %391 }
 0x221   : > { %381 = vrot.lane.b32.xlu1 %v379_v29, %s819_s8  ;;  %384 = vrot.lane.b32.xlu0 %v379_v29, %s820_s11  ;;  %s741_s8 = sshra.s32 %s463_s21, 4  ;;  %s742_s8 = int_to_ptr.hbm [resolvable:$true] %s741_s8 }
 0x222   : > { %s743_s11 = scalar_lea.hbm %s742_s8, 8  ;;  %p748_p5 = scmp.lt.s32.totalorder %s742_s8, %s1002_s5 }
 0x223   : > { %p744_p1 = scmp.ne.s32.totalorder %s742_s8, %s743_s11  ;;  %p749_p6 = scmp.lt.s32.totalorder %s747_s14, %s743_s11 }
 0x225   : > { %p745_p2 = pnand %p744_p1, %p892_p4  ;;  %p750_p7 = por %p749_p6, %p748_p5 }
 0x227   : > { %p746_p3 = pneg %p745_p2 }
 0x229   : > { %p751_p9 = pnand %p750_p7, %p746_p3 }
 0x293   : > { %v385_v31 = vpop.permute.xlu0 %384  ;;  %v382_v32 = vpop.permute.xlu1 %381 }
 0x294   : > { %410 = vmatpush.msra.mxu1 %v385_v31 }
 0x296   : > { %411 = vmatpush.msra.mxu1 %v382_v32 }
 0x298   : > { %412 = vmatpush.msra.mxu1 %v379_v29 }
 0x299   : > { %569 = vmatmul.msk.f32.vlgmr.msra.gmra.mxu1 %vm321_vm2, %v387_v33 }
 0x316   : > { %v414_v35 = vpop.f32.mrf.mxu1 }
 0x317   : > { %v415_v36 = vadd.f32 %v414_v35, %v392_v34 }
 0x319   : > { %v570_v37 = vmul.f32 -1.442695, %v415_v36 }
 0x31b   : > { %663 = vpow2.f32 %v570_v37 }
 0x321   : > { %v664_v38 = vpop.eup %663 }
 0x322   : > { %v420_v39 = vadd.f32 1.0, %v664_v38 }
 0x324   : > { %665 = vrcp.f32 %v420_v39  ;;  %v432_v43 = vand.u32 2147483648, %v420_v39  ;;  %v430_v45 = vand.u32 2147483647, %v420_v39  ;;  %vm426_vm10 = vweird.f32 %v420_v39 }
 0x326   : > { %v433_v47 = vor.u32 1.1754944e-38, %v432_v43  ;;  %vm431_vm12 = vcmp.eq.f32.partialorder %v430_v45, 8.507059e+37 }
 0x32a   : > { %v666_v40 = vpop.eup %665 }
 0x32b   : > { %v422_v41 = vmul.f32 %v666_v40, %v420_v39  ;;  %vm427_vm9 = vweird.f32 %v666_v40 }
 0x32c   : > { %vm428_vm11 = vmor %vm426_vm10, %vm427_vm9 }
 0x32d   : > { %v423_v42 = vsub.f32 1.0, %v422_v41 }
 0x32f   : > { %v424_v44 = vmul.f32 %v666_v40, %v423_v42 }
 0x331   : > { %v425_v46 = vadd.f32 %v666_v40, %v424_v44 }
 0x333   : > { %v429_v48 = vsel %vm428_vm11, %v666_v40, %v425_v46 }
 0x334   : > { %v434_v49 = vsel %vm431_vm12, %v433_v47, %v429_v48 }
 0x335   : > { %v437_v50 = vrot.slane %v434_v49, 4  ;;  %v443_v51 = vadd.f32 %v434_v49, %v940_v1 }
 0x337   : > { %v439_v52 = vmul.f32 %v437_v50, %v415_v36  ;;  %445 = vst.msk [vmem:[%s267_s7] sm:$0xf0] %vm444_vm13, %v443_v51 }
 0x339   : > { %v440_v53 = vadd.f32 %v439_v52, %v940_v1 }
 0x33b   : > { %442 = vst.msk [vmem:[%s267_s7] sm:$0xf] %vm441_vm14, %v440_v53 }
 0x33c   : > { %754 = shalt.err (!%p751_p9)
}
 0x33d   : > { %583 = dma.vmem_to_hbm [thread:$0]  (%p892_p4), %s461_s9, 128, %s463_s21, %s447_s10  }
 0x33e PF: > { %p600_p10 = scmp.ge.s32.totalorder %s813_s23, 2  ;;  %s474_s16 = sand.u32 1, %s793_s18  }
 0x33f   : > { %s475_s24 = scalar_lea.sflag [#allocation6], %s474_s16 }
 0x340   : > { %p593_p11 = pnand %p600_p10, %p899_p8 }
 0x342   : > { %p594_p12 = pneg %p593_p11 }
 0x344   : > { %788 = dma.done.wait (%p594_p12), %s475_s24, 128  }
 0x345   : > { %790 = vsyncadd (%p594_p12), %s475_s24, 4294967168  ;;  %s20_s23 = sadd.s32 1, %s813_s23   ;;  %s1007_s18 = smov %s797_s19 }
 0x346   : > { %p17_p13 = scmp.ge.s32.totalorder %s20_s23, 4   ;;  %s1008_s19 = smov %s801_s20 }
 0x347   : > { %s1009_s20 = smov %s905_s6  ;;  %s1010_s21 = smov %s809_s22 }
 0x348   : > { %s1011_s22 = smov %s1013_s26  ;;  %19 = sbr.rel (!%p17_p13) target bundleno = 6 (0x6), region = 92 }
 0x34d   :  { %481 = vsyncpa [#allocation5], 1 }
 0x34e   :  { %483 = vsyncpa [#allocation5 + $0x1], 1 }
 0x34f   :  { %484 = vsyncpa [#allocation8], 1 }
 0x350   :  { %485 = vsyncpa [#allocation6], 1 }
 0x351   :  { %487 = vsyncpa [#allocation6 + $0x1], 1 }

</bundles_post_ra>
